<compile_context>
chip_gen: v7x
topology: tpu7x:2x2x1
jax: 0.10.0
libtpu: 0.0.40
codegen_flags: <defaults>
</compile_context>

<pallas_src>
import functools
import math
from typing import NamedTuple

import jax
import jax.numpy as jnp
from jax.experimental import pallas as pl
from jax.experimental.pallas import tpu as pltpu


def _round_up(n, m):
    return ((n + m - 1) // m) * m


class PackedParams(NamedTuple):
    wab: jax.Array    # (L, 2*Dp)  packed Wa|Wb in the MXU dtype (bf16 default)
    bab: jax.Array    # (1, 2*Dp)  packed ba|bb, f32
    wc: jax.Array     # (1, Dp) if n_classes == 1 else (Dp, n_classes), f32
    bc: jax.Array     # (1, n_classes), f32
    hidden: int       # Dp (lane-aligned hidden width)
    n_classes: int


def prepare_params(params, mxu_dtype=jnp.bfloat16):
    """One-time weight packing; call once, reuse across forward calls."""
    wa, ba, wb, bb, wc, bc = params
    L, D = wa.shape
    n_classes = wc.shape[1]
    Dp = _round_up(D, 128)
    pad = Dp - D
    if pad:
        # Zero columns: tanh(0) = 0, so gated pad lanes are exactly 0 and the
        # matching (zero) Wc rows never change the result.
        wa = jnp.pad(wa, ((0, 0), (0, pad)))
        wb = jnp.pad(wb, ((0, 0), (0, pad)))
        ba = jnp.pad(ba, (0, pad))
        bb = jnp.pad(bb, (0, pad))
        wc = jnp.pad(wc, ((0, pad), (0, 0)))
    wab = jnp.concatenate([wa, wb], axis=1).astype(mxu_dtype)            # (L, 2*Dp)
    bab = jnp.concatenate([ba, bb]).reshape(1, 2 * Dp).astype(jnp.float32)
    if n_classes == 1:
        wc2 = wc.reshape(1, Dp).astype(jnp.float32)    # row vector for VPU path
    else:
        wc2 = wc.astype(jnp.float32)                   # (Dp, n_classes)
    bc2 = bc.reshape(1, n_classes).astype(jnp.float32)
    return PackedParams(wab, bab, wc2, bc2, Dp, n_classes)


def _gated_attn_kernel(x_ref, wab_ref, bab_ref, wc_ref, bc_ref, out_ref, *,
                       hidden, mxu_dtype, vpu_projection):
    """One row tile: A = Linear_c(tanh(.) * sigmoid(.)), hidden matmul fused."""
    x = x_ref[...]                                           # (tm, L)
    if x.dtype != mxu_dtype:
        x = x.astype(mxu_dtype)          # VPU cast, hidden under the x DMA

    # Fused attention_a / attention_b projection: one MXU matmul, f32 accumulate.
    h = jnp.dot(x, wab_ref[...], preferred_element_type=jnp.float32)
    h = h + bab_ref[...]                                     # (tm, 2*Dp), f32

    a = jnp.tanh(h[:, :hidden])                              # attention_a (EUP)
    b = jax.nn.sigmoid(h[:, hidden:])                        # attention_b (EUP)
    gated = a * b                                            # (tm, Dp), f32

    if vpu_projection:
        # n_classes == 1: VPU multiply + lane reduction -- avoids a
        # 1-of-256-lane MXU pass for the tiny final projection.
        A = jnp.sum(gated * wc_ref[...], axis=-1, keepdims=True)
    else:
        A = jnp.dot(gated, wc_ref[...], preferred_element_type=jnp.float32)
    out_ref[...] = (A + bc_ref[...]).astype(out_ref.dtype)


_MIN_GRID_STEPS = 4   # keep both v7x TensorCores fed for small/medium N


def attn_net_gated_forward(x, packed: PackedParams, *, row_tile=512):
    """Pallas forward for Attn_Net_Gated.  Returns (A, x) like the torch module."""
    N, L = x.shape
    Dp = packed.hidden
    n_classes = packed.n_classes
    out_dtype = x.dtype

    # Row tiling: sublane multiple is 8 for 4-byte dtypes, 16 for 2-byte.
    sub = 16 if jnp.dtype(x.dtype).itemsize == 2 else 8
    tm_cap = max(sub, _round_up(pl.cdiv(N, _MIN_GRID_STEPS), sub))
    tm = max(sub, min(_round_up(int(row_tile), sub), tm_cap))
    grid = (pl.cdiv(N, tm),)   # ragged tail handled by masked writeback

    # Explicit VMEM budget (v5e scoped default is only 16 MiB).
    x_item = jnp.dtype(x.dtype).itemsize
    wab_bytes = L * 2 * Dp * jnp.dtype(packed.wab.dtype).itemsize
    need = (2 * tm * L * x_item                # x tile (double-buffered)
            + 2 * wab_bytes                    # resident packed weights
            + 2 * tm * max(n_classes, 8) * 4   # output tile
            + 4 * tm * 2 * Dp * 4)             # h / a / b / gated temporaries
    vmem_limit = int(min(128 * 2 ** 20, max(2 * need, 32 * 2 ** 20)))

    kernel = functools.partial(
        _gated_attn_kernel, hidden=Dp, mxu_dtype=packed.wab.dtype,
        vpu_projection=(n_classes == 1))

    A = pl.pallas_call(
        kernel,
        out_shape=jax.ShapeDtypeStruct((N, n_classes), out_dtype),
        grid_spec=pltpu.PrefetchScalarGridSpec(
            num_scalar_prefetch=0,
            grid=grid,
            in_specs=[
                pl.BlockSpec((tm, L), lambda i: (i, 0)),          # x row tile
                pl.BlockSpec((L, 2 * Dp), lambda i: (0, 0)),      # packed Wa|Wb
                pl.BlockSpec((1, 2 * Dp), lambda i: (0, 0)),      # packed ba|bb
                pl.BlockSpec(packed.wc.shape, lambda i: (0, 0)),  # Wc
                pl.BlockSpec((1, n_classes), lambda i: (0, 0)),   # bc
            ],
            out_specs=pl.BlockSpec((tm, n_classes), lambda i: (i, 0)),
        ),
        compiler_params=pltpu.CompilerParams(
            dimension_semantics=("parallel",),     # megacore sharding on v7x
            vmem_limit_bytes=vmem_limit),
    )(x, packed.wab, packed.bab, packed.wc, packed.bc)
    return A, x


def init_params(key, L, D, n_classes, dtype=jnp.float32):
    """Mirrors init_max_weights: W ~ N(0, 1/sqrt(fan_in)), b = 0.
    Weights are stored transposed as (in_features, out_features)."""
    ka, kb, kc = jax.random.split(key, 3)
    stdv_LD = 1.0 / math.sqrt(L)
    stdv_Dn = 1.0 / math.sqrt(D)
    wa = (jax.random.normal(ka, (L, D)) * stdv_LD).astype(dtype)
    wb = (jax.random.normal(kb, (L, D)) * stdv_LD).astype(dtype)
    wc = (jax.random.normal(kc, (D, n_classes)) * stdv_Dn).astype(dtype)
    ba = jnp.zeros((D,), dtype)
    bb = jnp.zeros((D,), dtype)
    bc = jnp.zeros((n_classes,), dtype)
    return wa, ba, wb, bb, wc, bc


def _reference(x, params):
    wa, ba, wb, bb, wc, bc = params
    a = jnp.tanh(x @ wa + ba)
    b = jax.nn.sigmoid(x @ wb + bb)
    return (a * b) @ wc + bc


if __name__ == "__main__":
    # Small shapes consistent with the module (L = input dim, D = hidden).
    N, L, D, n_classes = 16, 64, 32, 1

    key = jax.random.PRNGKey(0)
    kx, kp = jax.random.split(key)
    x = jax.random.normal(kx, (N, L), dtype=jnp.float32)
    params = init_params(kp, L, D, n_classes)
    A_ref = _reference(x, params)

    # Exact f32 MXU path: must match the pure-JAX reference tightly.
    packed_f32 = prepare_params(params, mxu_dtype=jnp.float32)
    A_f32, x_out = attn_net_gated_forward(x, packed_f32, row_tile=8)
    A_f32 = jax.block_until_ready(A_f32)
    x_out = jax.block_until_ready(x_out)
    assert A_f32.shape == (N, n_classes)
    assert x_out.shape == x.shape
    assert jnp.allclose(A_f32, A_ref, atol=1e-5, rtol=1e-5)

    # Default bf16 MXU path (weights quantized to bf16; relaxed tolerance).
    packed_bf16 = prepare_params(params)
    A_bf16, _ = attn_net_gated_forward(x, packed_bf16, row_tile=512)
    A_bf16 = jax.block_until_ready(A_bf16)
    assert jnp.allclose(A_bf16, A_ref, atol=5e-2, rtol=5e-2)

    # Ragged N (not a multiple of the row tile) exercises the masked tail.
    N2 = 100
    x2 = jax.random.normal(jax.random.PRNGKey(1), (N2, L), dtype=jnp.float32)
    A2, _ = attn_net_gated_forward(x2, packed_f32, row_tile=32)
    A2 = jax.block_until_ready(A2)
    assert A2.shape == (N2, n_classes)
    assert jnp.allclose(A2, _reference(x2, params), atol=1e-5, rtol=1e-5)

    # n_classes > 1 path (MXU projection for the final linear).
    params3 = init_params(jax.random.PRNGKey(2), L, D, 3)
    packed3 = prepare_params(params3, mxu_dtype=jnp.float32)
    A3, _ = attn_net_gated_forward(x, packed3, row_tile=8)
    A3 = jax.block_until_ready(A3)
    assert A3.shape == (N, 3)
    assert jnp.allclose(A3, _reference(x, params3), atol=1e-5, rtol=1e-5)

    print("KERNEL_OK")
</pallas_src>

<mosaic_0001>
module attributes {stable_mosaic.version = 11 : i64} {
  func.func @_gated_attn_kernel(%arg0: i32, %arg1: memref<8x64xf32, #tpu.memory_space<vmem>>, %arg2: memref<64x256xf32, #tpu.memory_space<vmem>>, %arg3: memref<1x256xf32, #tpu.memory_space<vmem>>, %arg4: memref<1x128xf32, #tpu.memory_space<vmem>>, %arg5: memref<1x1xf32, #tpu.memory_space<vmem>>, %arg6: memref<8x1xf32, #tpu.memory_space<vmem>>) attributes {dimension_semantics = [#tpu.dimension_semantics<parallel>], iteration_bounds = array<i64: 2>, scalar_prefetch = 0 : i64, scratch_operands = 0 : i64, tpu.core_type = #tpu.core_type<tc>, window_params = [{transform_indices = @transform_0, window_bounds = array<i64: 8, 64>}, {pipeline_mode = #tpu.pipeline_mode<synchronous>, transform_indices = @transform_1, window_bounds = array<i64: 64, 256>}, {pipeline_mode = #tpu.pipeline_mode<synchronous>, transform_indices = @transform_2, window_bounds = array<i64: 1, 256>}, {pipeline_mode = #tpu.pipeline_mode<synchronous>, transform_indices = @transform_3, window_bounds = array<i64: 1, 128>}, {pipeline_mode = #tpu.pipeline_mode<synchronous>, transform_indices = @transform_4, window_bounds = array<i64: 1, 1>}, {transform_indices = @transform_5, window_bounds = array<i64: 8, 1>}]} {
    %c0 = arith.constant 0 : index
    %c0_0 = arith.constant 0 : index
    %0 = vector.load %arg1[%c0, %c0_0] : memref<8x64xf32, #tpu.memory_space<vmem>>, vector<8x64xf32>
    %c0_1 = arith.constant 0 : index
    %c0_2 = arith.constant 0 : index
    %1 = vector.load %arg2[%c0_1, %c0_2] : memref<64x256xf32, #tpu.memory_space<vmem>>, vector<64x256xf32>
    %cst = arith.constant dense<0.000000e+00> : vector<8x256xf32>
    %2 = tpu.matmul %0, %1, %cst {dimension_numbers = #tpu.dot_dimension_numbers<[1], [0], [0], [1], [0, 0, 1, 1], [], []>} : vector<8x64xf32>, vector<64x256xf32>, vector<8x256xf32> -> vector<8x256xf32>
    %c0_3 = arith.constant 0 : index
    %c0_4 = arith.constant 0 : index
    %3 = vector.load %arg3[%c0_3, %c0_4] : memref<1x256xf32, #tpu.memory_space<vmem>>, vector<1x256xf32>
    %4 = vector.broadcast %3 : vector<1x256xf32> to vector<8x256xf32>
    %5 = arith.addf %2, %4 : vector<8x256xf32>
    %6 = vector.extract_strided_slice %5 {offsets = [0, 0], sizes = [8, 128], strides = [1, 1]} : vector<8x256xf32> to vector<8x128xf32>
    %7 = math.tanh %6 : vector<8x128xf32>
    %8 = vector.extract_strided_slice %5 {offsets = [0, 128], sizes = [8, 128], strides = [1, 1]} : vector<8x256xf32> to vector<8x128xf32>
    %9 = arith.negf %8 : vector<8x128xf32>
    %10 = math.exp %9 : vector<8x128xf32>
    %cst_5 = arith.constant 1.000000e+00 : f32
    %11 = vector.broadcast %cst_5 : f32 to vector<8x128xf32>
    %12 = arith.addf %11, %10 : vector<8x128xf32>
    %13 = arith.divf %11, %12 : vector<8x128xf32>
    %14 = arith.mulf %7, %13 : vector<8x128xf32>
    %c0_6 = arith.constant 0 : index
    %c0_7 = arith.constant 0 : index
    %15 = vector.load %arg4[%c0_6, %c0_7] : memref<1x128xf32, #tpu.memory_space<vmem>>, vector<1x128xf32>
    %16 = vector.broadcast %15 : vector<1x128xf32> to vector<8x128xf32>
    %17 = arith.mulf %14, %16 : vector<8x128xf32>
    %cst_8 = arith.constant dense<0.000000e+00> : vector<8xf32>
    %18 = vector.multi_reduction <add>, %17, %cst_8 [1] : vector<8x128xf32> to vector<8xf32>
    %19 = vector.shape_cast %18 : vector<8xf32> to vector<8x1xf32>
    %c0_9 = arith.constant 0 : index
    %c0_10 = arith.constant 0 : index
    %20 = vector.load %arg5[%c0_9, %c0_10] : memref<1x1xf32, #tpu.memory_space<vmem>>, vector<1x1xf32>
    %21 = vector.broadcast %20 : vector<1x1xf32> to vector<8x1xf32>
    %22 = arith.addf %19, %21 : vector<8x1xf32>
    %c0_11 = arith.constant 0 : index
    %c0_12 = arith.constant 0 : index
    %23 = vector.load %arg6[%c0_11, %c0_12] : memref<8x1xf32, #tpu.memory_space<vmem>>, vector<8x1xf32>
    tpu.vector_store %arg6[%c0_11, %c0_12], %22 {strides = array<i32>} : memref<8x1xf32, #tpu.memory_space<vmem>>, vector<8x1xf32>,
    return
  }
  func.func @transform_0(%arg0: i32) -> (i32, i32) {
    %c0_i32 = arith.constant 0 : i32
    %c0_i32_0 = arith.constant 0 : i32
    return %arg0, %c0_i32 : i32, i32
  }
  func.func @transform_1(%arg0: i32) -> (i32, i32) {
    %c0_i32 = arith.constant 0 : i32
    %c0_i32_0 = arith.constant 0 : i32
    %c0_i32_1 = arith.constant 0 : i32
    return %c0_i32, %c0_i32_0 : i32, i32
  }
  func.func @transform_2(%arg0: i32) -> (i32, i32) {
    %c0_i32 = arith.constant 0 : i32
    %c0_i32_0 = arith.constant 0 : i32
    %c0_i32_1 = arith.constant 0 : i32
    return %c0_i32, %c0_i32_0 : i32, i32
  }
  func.func @transform_3(%arg0: i32) -> (i32, i32) {
    %c0_i32 = arith.constant 0 : i32
    %c0_i32_0 = arith.constant 0 : i32
    %c0_i32_1 = arith.constant 0 : i32
    return %c0_i32, %c0_i32_0 : i32, i32
  }
  func.func @transform_4(%arg0: i32) -> (i32, i32) {
    %c0_i32 = arith.constant 0 : i32
    %c0_i32_0 = arith.constant 0 : i32
    %c0_i32_1 = arith.constant 0 : i32
    return %c0_i32, %c0_i32_0 : i32, i32
  }
  func.func @transform_5(%arg0: i32) -> (i32, i32) {
    %c0_i32 = arith.constant 0 : i32
    %c0_i32_0 = arith.constant 0 : i32
    return %arg0, %c0_i32 : i32, i32
  }
}

</mosaic_0001>

<bundles_post_ra>
// kernel: tpu_custom_call.1
= control target key start
LH: loop header
LB: loop body
LE: loop exit
PB: predicated region body
PF: predicated region fallthrough
CT: control target
= control target key end

     0   :  { %s841_s0 = inlined_call_operand.hbm [shape: f32[16,64], index: 0, kind: input, shape index: {}]   ;;  %s842_s1 = inlined_call_operand.hbm [shape: f32[64,256], index: 1, kind: input, shape index: {}]   ;;  %s843_s2 = inlined_call_operand.vmem [shape: f32[1,256], index: 2, kind: input, shape index: {}]   ;;  %s844_s3 = inlined_call_operand.vmem [shape: f32[1,128], index: 3, kind: input, shape index: {}]   ;;  %s845_s4 = inlined_call_operand.<no memory space> [shape: f32[1,1], index: 4, kind: input, shape index: {}]   ;;  %s846_s5 = inlined_call_operand.vmem [shape: f32[16,1], index: 5, kind: output, shape index: {}]  }
   0x1   :  { %v10_v0 = vstv %s845_s4 }
   0x2   :  { %11 = vst [vmem:[#allocation2] sm:$0x1] %v10_v0 }
   0x3   :  { %12 = vsyncpa [#allocation4], 0 }
   0x4   :  { %14 = vsyncpa [#allocation4 + $0x1], 0 }
   0x5   :  { %15 = vsyncpa [#allocation6], 0  ;;  %s691_s20 = smov 0   ;;  %s693_s21 = smov 0  }
   0x6   :  { %s695_s22 = smov 0   ;;  %s697_s23 = smov 0  }
   0x7 LB: > { %s710_s4 = sadd.s32 4294967295, %s651_s23   ;;  %p41_p0 = scmp.ne.s32.totalorder %s643_s21, %s639_s20  ;;  %s651_s23 = sphi %s697_s23, %s861_s23   ;;  %s647_s22 = sphi %s695_s22, %s860_s22   ;;  %s643_s21 = sphi %s693_s21, %s859_s21   ;;  %s639_s20 = sphi %s691_s20, %s858_s20  }
   0x8   : > { %p847_p1 = scmp.eq.s32.totalorder %s710_s4, 0  ;;  %p465_p2 = scmp.ge.s32.totalorder %s651_s23, 1 }
   0x9   : > { %p162_p3 = scmp.lt.s32.totalorder %s651_s23, 3  ;;  %s653_s26 = smov [#allocation5]  }
   0xa   : > { %p718_p4 = por %p847_p1, %p41_p0  ;;  %s174_s27 = sshll.u32 %s653_s26, 4  ;;  %s175_s27 = int_to_ptr.vmem [resolvable:$true] %s174_s27 }
   0xb   : > { %p722_p5 = pnand %p465_p2, %p162_p3  ;;  %s735_s29 = sadd.s32 1, %s651_s23  }
   0xc   : > { %s850_s24 = scalar_select %p718_p4, 1, 0 }
   0xd   : > { %s851_s25 = scalar_select %p722_p5, 1, 0 }
   0xe   : > { %p502_p6 = pneg %p722_p5  ;;  %s28_s30 = sadd.s32 1, %s647_s22 }
   0xf   : > { %s25_s6 = ssub.s32 %s651_s23, %s735_s29  ;;  %s555_s9 = scalar_lea.hbm %s842_s1, 2048 }
  0x10   : > { %p730_p7 = pnand %p502_p6, %p847_p1  ;;  %p556_p8 = scmp.ne.s32.totalorder %s842_s1, %s555_s9 }
  0x11   : > { %p562_p12 = scmp.lt.u32.totalorder %s555_s9, %s842_s1 }
  0x12   : > { %p557_p9 = pneg %p730_p7 }
  0x14   : > { %p558_p10 = pnand %p557_p9, %p556_p8 }
  0x16   : > { %p559_p11 = pneg %p558_p10 }
  0x18   : > { %p564_p13 = pnand %p562_p12, %p559_p11 }
  0x1a   : > { %567 = shalt.err (!%p564_p13)
}
  0x1b   : > { %s568_s14 = scalar_lea.vmem %s175_s27, 2048  ;;  %p576_p6 = scmp.lt.s32.totalorder %s175_s27, %s175_s27 }
  0x1c   : > { %p569_p0 = scmp.ne.s32.totalorder %s175_s27, %s568_s14  ;;  %p577_p1 = scmp.lt.s32.totalorder %s568_s14, %s568_s14 }
  0x1e   : > { %p571_p2 = pnand %p569_p0, %p557_p9  ;;  %p578_p4 = por %p577_p1, %p576_p6 }
  0x20   : > { %p572_p3 = pneg %p571_p2 }
  0x22   : > { %p579_p5 = pnand %p578_p4, %p572_p3 }
  0x24   : > { %582 = shalt.err (!%p579_p5)
}
  0x25   : > { %s654_s15 = smov 256   ;;  %s655_s16 = smov 16  }
  0x26   : > { %505 = dma.hbm_to_vmem [thread:$0]  (!%p730_p7), %s842_s1, 2048, %s175_s27, [#allocation6], %s654_s15, %s654_s15, %s655_s16  }
  0x27   : > { %p26_p8 = scmp.eq.s32.totalorder %s25_s6, 0  ;;  %p35_p9 = scmp.ne.s32.totalorder %s647_s22, %s643_s21 }
  0x28   : > { %p36_p1 = scmp.eq.s32.totalorder %s651_s23, 0  ;;  %p511_p4 = scmp.lt.s32.totalorder %s651_s23, 2 }
  0x29   : > { %s761_s19 = scalar_select %p26_p8, %s647_s22, %s28_s30  }
  0x2a   : > { %p37_p5 = por %p36_p1, %p35_p9  ;;  %s197_s20 = sand.u32 1, %s647_s22  }
  0x2b   : > { %s468_s26 = sshll.u32 %s197_s20, 3  ;;  %s469_s7 = sshll.u32 %s651_s23, 7 }
  0x2c   : > { %s768_s10 = scalar_lea.hbm %s841_s0, %s469_s7  ;;  %s201_s27 = scalar_lea.vmem [#allocation3], %s468_s26 }
  0x2d   : > { %s208_s28 = sshll.u32 %s201_s27, 4  ;;  %p772_p7 = pnand %p511_p4, %p37_p5  ;;  %s770_s28 = int_to_ptr.vmem [resolvable:$true] %s208_s28 }
  0x2e   : > { %s198_s23 = scalar_lea.sflag [#allocation4], %s197_s20  ;;  %s583_s6 = scalar_lea.hbm %s768_s10, 128 }
  0x2f   : > { %p584_p10 = scmp.ne.s32.totalorder %s768_s10, %s583_s6  ;;  %p585_p11 = pneg %p772_p7 }
  0x30   : > { %s588_s13 = scalar_lea.hbm %s841_s0, 256  ;;  %p589_p0 = scmp.lt.u32.totalorder %s768_s10, %s841_s0 }
  0x31   : > { %p586_p12 = pnand %p585_p11, %p584_p10  ;;  %p590_p2 = scmp.lt.u32.totalorder %s588_s13, %s583_s6 }
  0x32   : > { %p592_p6 = scmp.lt.u32.totalorder %s583_s6, %s768_s10 }
  0x33   : > { %p587_p13 = pneg %p586_p12  ;;  %p591_p3 = por %p590_p2, %p589_p0 }
  0x35   : > { %p593_p8 = por %p592_p6, %p591_p3 }
  0x37   : > { %p594_p9 = pnand %p593_p8, %p587_p13 }
  0x39   : > { %597 = shalt.err (!%p594_p9)
}
  0x3a   : > { %s598_s16 = scalar_lea.vmem %s770_s28, 128  ;;  %s656_s17 = smov [#allocation3]  }
  0x3b   : > { %p599_p1 = scmp.ne.s32.totalorder %s770_s28, %s598_s16  ;;  %s603_s18 = sshll.u32 %s656_s17, 4  ;;  %s604_s18 = int_to_ptr.vmem [resolvable:$false] %s603_s18 }
  0x3c   : > { %s605_s20 = scalar_lea.vmem %s604_s18, 256  ;;  %p606_p10 = scmp.lt.s32.totalorder %s770_s28, %s604_s18 }
  0x3d   : > { %p601_p4 = pnand %p599_p1, %p585_p11  ;;  %p607_p12 = scmp.lt.s32.totalorder %s605_s20, %s598_s16 }
  0x3f   : > { %p602_p5 = pneg %p601_p4  ;;  %p608_p0 = por %p607_p12, %p606_p10 }
  0x41   : > { %p609_p2 = pnand %p608_p0, %p602_p5 }
  0x43   : > { %612 = shalt.err (!%p609_p2)
}
  0x44   : > { %509 = dma.hbm_to_vmem [thread:$0]  (!%p772_p7), %s768_s10, 128, %s770_s28, %s198_s23  }
  0x45   : > { %p854_p13 = scmp.ne.s32.totalorder %s851_s25, 0 }
  0x46   : > { %s219_s26 = sand.u32 (!%p854_p13), 1, %s643_s21   ;;  %p855_p11 = scmp.ne.s32.totalorder (!%p854_p13), %s850_s24, 0 }
  0x47   : > { %217 = sbr.rel (%p854_p13) target bundleno = 491 (0x1eb), region = 40  ;;  %s804_s7 = sshll.u32 (!%p854_p13), %s219_s26, 3 }
  0x48   : > { %s220_s8 = scalar_lea.sflag (!%p854_p13), [#allocation4], %s219_s26  ;;  %s223_s9 = scalar_lea.vmem (!%p854_p13), [#allocation3], %s804_s7 }
  0x4e   : > { %630 = dma.done.wait (%p855_p11), %s220_s8, 128  }
  0x4f   : > { %632 = vsyncadd (%p855_p11), %s220_s8, 4294967168  ;;  %p856_p3 = scmp.eq.s32.totalorder %s710_s4, 0 }
  0x51   : > { %634 = dma.done.wait (%p856_p3), [#allocation6], 2048   ;;  %p857_p7 = pmov %p856_p3 }
  0x52   : > { %v657_v1 = vmov 0.0   ;;  %v259_v2 = vld [vmem:[#allocation5 + $0x8] sm:$0xff]  ;;  %v261_v3 = vld [vmem:[#allocation5 + $0x18] sm:$0xff]  ;;  %v258_v4 = vld [vmem:[#allocation5] sm:$0xff]  ;;  %vm286_vm0 = vcmask 523264   ;;  %v276_v27 = vlaneseq  ;;  %p253_p6 = scmp.lt.s32.totalorder %s710_s4, 1 }
  0x53   : > { %636 = vsyncadd (%p857_p7), [#allocation6], 4294965248  ;;  %354 = vmatprep.mubr.f32.mxu0 %v657_v1  ;;  %v480_v5 = vpack.c.bf16 %v261_v3, %v259_v2  ;;  %v260_v6 = vld [vmem:[#allocation5 + $0x10] sm:$0xff]  ;;  %v263_v7 = vld [vmem:[#allocation5 + $0x28] sm:$0xff]  ;;  %vm387_vm1 = vcmask 7168  }
  0x54   : > { %v265_v8 = vld [vmem:[#allocation5 + $0x38] sm:$0xff]  ;;  %v482_v9 = vpack.c.bf16 %v260_v6, %v258_v4  ;;  %v262_v11 = vld [vmem:[#allocation5 + $0x20] sm:$0xff]  ;;  %v264_v12 = vld [vmem:[#allocation5 + $0x30] sm:$0xff]  ;;  %v277_v28 = vshrl.u32 %v276_v27, 7  ;;  %s863_s4 = smov (!%p253_p6, %s710_s4), 1 }
  0x55   : > { %v484_v10 = vpack.c.bf16 %v265_v8, %v263_v7  ;;  %v267_v13 = vld [vmem:[#allocation5 + $0x48] sm:$0xff]  ;;  %481 = vmatprep.subr.bf16.mxu0 %v480_v5  ;;  %v269_v14 = vld [vmem:[#allocation5 + $0x58] sm:$0xff]  ;;  %v486_v15 = vpack.c.bf16 %v264_v12, %v262_v11  ;;  %v266_v17 = vld [vmem:[#allocation5 + $0x40] sm:$0xff]  ;;  %s473_s28 = sshll.u32 %s863_s4, 3 }
  0x56   : > { %483 = vmatpush1.bf16.msra.mxu0 %v482_v9  ;;  %v488_v16 = vpack.c.bf16 %v269_v14, %v267_v13  ;;  %v268_v18 = vld [vmem:[#allocation5 + $0x50] sm:$0xff]  ;;  %v271_v19 = vld [vmem:[#allocation5 + $0x68] sm:$0xff]  ;;  %v273_v20 = vld [vmem:[#allocation5 + $0x78] sm:$0xff]  ;;  %v282_v29 = vsub.s32 1, %v277_v28  ;;  %v278_v36 = vsub.s32 0, %v277_v28  ;;  %s256_s6 = scalar_lea.vmem %s846_s5, %s473_s28 }
  0x57   : > { %485 = vmatprep.subr.bf16.mxu0 %v484_v10  ;;  %v490_v21 = vpack.c.bf16 %v268_v18, %v266_v17  ;;  %v492_v22 = vpack.c.bf16 %v273_v20, %v271_v19  ;;  %v270_v23 = vld [vmem:[#allocation5 + $0x60] sm:$0xff]  ;;  %v272_v24 = vld [vmem:[#allocation5 + $0x70] sm:$0xff]  ;;  %v476_v43 = vld [vmem:[%s844_s3] ss:$0 sm:$0xff] }
  0x58   : > { %v494_v25 = vpack.c.bf16 %v272_v24, %v270_v23  ;;  %v257_v26 = vld [vmem:[%s223_s9] sm:$0xff]  ;;  %v477_v46 = vld [vmem:[#allocation2] ss:$0 sm:$0xff] }
  0x59   : > { %v274_v30 = vld [vmem:[%s843_s2] sm:$0x3] }
  0x5a   : > { %487 = vmatpush1.bf16.msra.mxu0 %v486_v15  ;;  %v283_v31 = vrot.slane %v274_v30, %v282_v29  ;;  %v279_v37 = vrot.slane %v274_v30, %v278_v36 }
  0x5b   : > { %489 = vmatprep.subr.bf16.mxu0 %v488_v16 }
  0x5e   : > { %491 = vmatpush1.bf16.msra.mxu0 %v490_v21 }
  0x5f   : > { %493 = vmatprep.subr.bf16.mxu0 %v492_v22 }
  0x62   : > { %495 = vmatpush1.bf16.msra.mxu0 %v494_v25 }
  0x65   : > { %474 = vmatmul.mubr.msk.f32.vlgmr.msra.gmra.mrb[0].mxu0 %vm286_vm0, %v257_v26 }
 0x138   : > { %v356_v32 = vpop.f32.mrb[0].mxu0 }
 0x139   : > { %v358_v33 = vpop.f32.mrb[1].mxu0  ;;  %v357_v38 = vadd.f32 %v356_v32, %v279_v37 }
 0x13a   : > { %v359_v34 = vadd.f32 %v358_v33, %v283_v31 }
 0x13c   : > { %v475_v35 = vmul.f32 -1.442695, %v359_v34 }
 0x13e   : > { %549 = vpow2.f32 %v475_v35 }
 0x13f   : > { %551 = vtanh.f32 %v357_v38 }
 0x148   : > { %v550_v39 = vpop.eup %549 }
 0x149   : > { %v365_v40 = vadd.f32 1.0, %v550_v39  ;;  %v552_v41 = vpop.eup %551 }
 0x14b   : > { %553 = vrcp.f32 %v365_v40 }
 0x155   : > { %v554_v42 = vpop.eup %553 }
 0x156   : > { %v368_v44 = vmul.f32 %v554_v42, %v552_v41 }
 0x158   : > { %v376_v45 = vmul.f32 %v476_v43, %v368_v44 }
 0x15a   : > { %377 = vadd.xlane.f32.xlu0 %v376_v45 }
 0x1e7   : > { %v378_v47 = vpop.xlane.xlu0 %377 }
 0x1e8   : > { %v386_v48 = vadd.f32 %v477_v46, %v378_v47 }
 0x1ea   : > { %388 = vst.msk [vmem:[%s256_s6] sm:$0xff] %vm387_vm1, %v386_v48 }
 0x1eb PF: > { %p18_p8 = scmp.ge.s32.totalorder %s735_s29, 4   ;;  %s858_s20 = smov %s643_s21 }
 0x1ec   : > { %s859_s21 = smov %s647_s22  ;;  %s860_s22 = smov %s761_s19 }
 0x1ed   : > { %s861_s23 = smov %s735_s29  ;;  %20 = sbr.rel (!%p18_p8) target bundleno = 7 (0x7), region = 84 }
 0x1f4   :  { %408 = vsyncpa [#allocation4], 1 }
 0x1f5   :  { %410 = vsyncpa [#allocation4 + $0x1], 1 }
 0x1f6   :  { %411 = vsyncpa [#allocation6], 1 }

</bundles_post_ra>
